<compile_context>
chip_gen: v5e
topology: v5e:2x2
jax: 0.10.0
libtpu: 0.0.40
codegen_flags: <defaults>
</compile_context>

<pallas_src>
import math

import jax
import jax.numpy as jnp
from jax.experimental import pallas as pl
from jax.experimental.pallas import tpu as pltpu


_LANE = 128       # feature dims padded to multiples of this (lane-dense)
_ROW_ALIGN = 32   # row alignment covering int8 (32) / bf16 (16) / f32 (8) sublane tiles


def _round_up(a: int, b: int) -> int:
    return (a + b - 1) // b * b


def _vmem_capacity_bytes() -> int:
    try:
        return int(pltpu.get_tpu_info().vmem_capacity_bytes)
    except Exception:
        return 64 * 1024 * 1024  # conservative fallback: v7x per-TC VMEM


def _ddn_kernel(x_ref, mask_ref, w1_ref, b1_ref, w2_ref, b2_ref, o_ref, acc_ref):
    """One (row-tile i, h2-chunk j) grid step.

    grid = (row tiles ["parallel"], h2 chunks ["arbitrary"]).  acc_ref holds the
    partial second matmul across h2 chunks; bias + writeback happen on the last
    chunk.  With small H the h2 axis collapses to a single chunk.
    """
    j = pl.program_id(1)

    @pl.when(j == 0)
    def _init():
        acc_ref[...] = jnp.zeros_like(acc_ref)

    # Deterministic dropout.  1/(1-p) is folded into W_in host-side and the mask
    # is a 0/1 int8 stream, so this is a single bf16 VPU select (x is already bf16).
    xd = jnp.where(mask_ref[...] != 0, x_ref[...], jnp.zeros_like(x_ref[...]))

    # linear_in chunk: (tm, hp) @ (hp, tk2), bf16 operands, f32 accumulation.
    h = jnp.dot(xd, w1_ref[...], preferred_element_type=jnp.float32)
    h = jnp.maximum(h + b1_ref[0:1, :], 0.0).astype(jnp.bfloat16)

    # linear_out partial: (tm, tk2) @ (tk2, hp), accumulated over h2 chunks.
    acc_ref[...] += jnp.dot(h, w2_ref[...], preferred_element_type=jnp.float32)

    @pl.when(j == pl.num_programs(1) - 1)
    def _finalize():
        o_ref[...] = (acc_ref[...] + b2_ref[0:1, :]).astype(o_ref.dtype)


def deterministic_dropout_network(x, mask, w1, b1, w2, b2, dropout_prob,
                                  *, tile_m=512, out_dtype=None):
    """y = linear_out(relu(linear_in(x * mask / (1 - p)))).

    x, mask: (..., H) with a 0/1 keep-mask.  w1: (H, 2H), b1: (2H,),
    w2: (2H, H), b2: (H,) -- weights already stored (in_features, out_features)
    so the kernel computes x @ W + b directly on the MXU.
    Set out_dtype=jnp.bfloat16 if downstream tolerates a bf16 output (halves writeback).
    """
    orig_shape = x.shape
    H = orig_shape[-1]
    N = math.prod(orig_shape[:-1]) if len(orig_shape) > 1 else 1
    H2 = w1.shape[1]
    out_dtype = x.dtype if out_dtype is None else out_dtype
    scale = 1.0 / (1.0 - dropout_prob)

    x = x.reshape(N, H)
    mask = mask.reshape(N, H)

    # ---- layout decisions ---------------------------------------------------
    hp = _round_up(H, _LANE)          # lane-dense feature dims
    h2p = _round_up(H2, _LANE)
    # Pad rows only to the sublane alignment (waste <= 31 rows), not to tile_m;
    # Pallas masks the partial last row block.
    n_pad = _round_up(N, _ROW_ALIGN)
    tile_m = max(_ROW_ALIGN, min(_round_up(tile_m, _ROW_ALIGN), n_pad))
    n_row_tiles = pl.cdiv(n_pad, tile_m)
    if n_row_tiles == 1 and n_pad >= 2 * _ROW_ALIGN:
        # Guarantee >=2 row tiles so the "parallel" axis spans both v7x TensorCores.
        tile_m = _round_up(pl.cdiv(n_pad, 2), _ROW_ALIGN)
        n_row_tiles = pl.cdiv(n_pad, tile_m)

    # ---- generation-aware VMEM plan -----------------------------------------
    vmem_cap = _vmem_capacity_bytes()
    out_bytes = jnp.dtype(out_dtype).itemsize
    # Row-tile activation footprint: double-buffered x (bf16) + mask (int8) +
    # out, plus the f32 accumulator scratch.
    act_bytes = tile_m * hp * (2 * 2 + 2 * 1 + 2 * out_bytes + 4)
    budget = int(0.75 * vmem_cap) - act_bytes
    # Fully resident (single-buffered) bf16 weights + the h temporary.
    resident_bytes = 4 * hp * h2p + tile_m * h2p * 6
    if resident_bytes <= budget:
        tk2, k_tiles = h2p, 1
    else:
        # Stream double-buffered (hp, tk2)/(tk2, hp) weight chunks over a second
        # grid axis; pad h2p so tk2 * k_tiles covers it exactly (zero-padded h
        # columns contribute exactly 0 through relu and the zero W_out rows).
        tk2_max = (budget // (8 * hp + 6 * tile_m)) // _LANE * _LANE
        tk2_max = max(_LANE, min(tk2_max, h2p))
        k_tiles = pl.cdiv(h2p, tk2_max)
        tk2 = _round_up(pl.cdiv(h2p, k_tiles), _LANE)
        h2p = tk2 * k_tiles
    weights_resident = k_tiles == 1
    # Grid-invariant operands: single-buffer them (default double-buffer is VMEM waste).
    const_mode = pl.Buffered(1)
    w_mode = const_mode if weights_resident else None

    # ---- host-side one-time prep (weights are static) ------------------------
    # x -> bf16 (exact w.r.t. the 0/1 mask multiply), mask -> int8, dropout scale
    # folded into W_in before the bf16 cast.
    # TODO(synk): if DeterministicDropout ever emits non-binary mask values, ship
    # the mask as bf16 and multiply instead of the int8 select.
    x_p = jnp.pad(x.astype(jnp.bfloat16), ((0, n_pad - N), (0, hp - H)))
    mask_p = jnp.pad(mask.astype(jnp.int8), ((0, n_pad - N), (0, hp - H)))
    w1_p = jnp.pad((w1 * scale).astype(jnp.bfloat16), ((0, hp - H), (0, h2p - H2)))
    w2_p = jnp.pad(w2.astype(jnp.bfloat16), ((0, h2p - H2), (0, hp - H)))
    # Biases stay f32 (added to the f32 accumulator); pre-broadcast to 8 sublanes
    # so their blocks are (8, 128)-aligned.
    b1_p = jnp.broadcast_to(jnp.pad(b1.astype(jnp.float32), (0, h2p - H2)), (8, h2p))
    b2_p = jnp.broadcast_to(jnp.pad(b2.astype(jnp.float32), (0, hp - H)), (8, hp))

    out = pl.pallas_call(
        _ddn_kernel,
        out_shape=jax.ShapeDtypeStruct((n_pad, hp), out_dtype),
        grid_spec=pltpu.PrefetchScalarGridSpec(
            num_scalar_prefetch=0,
            grid=(n_row_tiles, k_tiles),
            in_specs=[
                pl.BlockSpec((tile_m, hp), lambda i, j: (i, 0)),                      # x    (bf16)
                pl.BlockSpec((tile_m, hp), lambda i, j: (i, 0)),                      # mask (int8)
                pl.BlockSpec((hp, tk2), lambda i, j: (0, j), pipeline_mode=w_mode),    # W_in  (scale folded)
                pl.BlockSpec((8, tk2), lambda i, j: (0, j), pipeline_mode=w_mode),     # b_in  (f32)
                pl.BlockSpec((tk2, hp), lambda i, j: (j, 0), pipeline_mode=w_mode),    # W_out
                pl.BlockSpec((8, hp), lambda i, j: (0, 0), pipeline_mode=const_mode),  # b_out (f32)
            ],
            out_specs=pl.BlockSpec((tile_m, hp), lambda i, j: (i, 0)),
            scratch_shapes=[pltpu.VMEM((tile_m, hp), jnp.float32)],                    # y accumulator
        ),
        compiler_params=pltpu.CompilerParams(
            dimension_semantics=("parallel", "arbitrary"),
            vmem_limit_bytes=int(0.85 * vmem_cap),   # gen-aware: ~54 MiB v7x, ~109 MiB v5e/v6e
        ),
    )(x_p, mask_p, w1_p, b1_p, w2_p, b2_p)

    return out[:N, :H].reshape(orig_shape)


def _init_linear(key, in_features, out_features, dtype=jnp.float32):
    """PyTorch nn.Linear default init: U(-1/sqrt(in), 1/sqrt(in))."""
    kw, kb = jax.random.split(key)
    bound = 1.0 / (in_features ** 0.5)
    w = jax.random.uniform(kw, (out_features, in_features), dtype, -bound, bound)
    b = jax.random.uniform(kb, (out_features,), dtype, -bound, bound)
    return w.T, b  # (in, out), (out,)


if __name__ == "__main__":
    hid_dim = 32
    dropout_prob = 0.1
    batch, seq = 2, 8

    key = jax.random.PRNGKey(0)
    kx, kmask, k1, k2 = jax.random.split(key, 4)

    x = jax.random.normal(kx, (batch, seq, hid_dim), jnp.float32)
    # deterministic dropout: explicit 0/1 keep-mask
    mask = (jax.random.uniform(kmask, (batch, seq, hid_dim)) > dropout_prob).astype(jnp.float32)

    w1, b1 = _init_linear(k1, hid_dim, 2 * hid_dim)   # linear_in
    w2, b2 = _init_linear(k2, 2 * hid_dim, hid_dim)   # linear_out

    out = deterministic_dropout_network(x, mask, w1, b1, w2, b2, dropout_prob)
    out = jax.block_until_ready(out)
    assert out.shape == (batch, seq, hid_dim)

    scale = 1.0 / (1.0 - dropout_prob)

    # (1) bf16-matched reference (same quantization choices as the kernel) -> tight check.
    xd = jnp.where(mask != 0, x.astype(jnp.bfloat16), jnp.zeros_like(x, jnp.bfloat16))
    w1b = (w1 * scale).astype(jnp.bfloat16)
    w2b = w2.astype(jnp.bfloat16)
    h_ref = jnp.dot(xd, w1b, preferred_element_type=jnp.float32) + b1
    h_ref = jnp.maximum(h_ref, 0.0).astype(jnp.bfloat16)
    ref_bf16 = jnp.dot(h_ref, w2b, preferred_element_type=jnp.float32) + b2
    assert jnp.allclose(out, ref_bf16, atol=2e-3, rtol=2e-3)

    # (2) pure-f32 module reference -> loose sanity check (bf16 MXU path adds noise).
    ref_f32 = jnp.maximum((x * mask * scale) @ w1 + b1, 0.0) @ w2 + b2
    assert jnp.allclose(out, ref_f32, atol=1e-1, rtol=1e-1)

    print("KERNEL_OK")
</pallas_src>

<mosaic_0001>
module attributes {stable_mosaic.version = 11 : i64} {
  func.func @_ddn_kernel(%arg0: i32, %arg1: i32, %arg2: memref<32x128xbf16, #tpu.memory_space<vmem>>, %arg3: memref<32x128xi8, #tpu.memory_space<vmem>>, %arg4: memref<128x128xbf16, #tpu.memory_space<vmem>>, %arg5: memref<8x128xf32, #tpu.memory_space<vmem>>, %arg6: memref<128x128xbf16, #tpu.memory_space<vmem>>, %arg7: memref<8x128xf32, #tpu.memory_space<vmem>>, %arg8: memref<32x128xf32, #tpu.memory_space<vmem>>, %arg9: memref<32x128xf32, #tpu.memory_space<vmem>>) attributes {dimension_semantics = [#tpu.dimension_semantics<parallel>, #tpu.dimension_semantics<arbitrary>], iteration_bounds = array<i64: 1, 1>, scalar_prefetch = 0 : i64, scratch_operands = 1 : i64, tpu.core_type = #tpu.core_type<tc>, window_params = [{transform_indices = @transform_0, window_bounds = array<i64: 32, 128>}, {transform_indices = @transform_1, window_bounds = array<i64: 32, 128>}, {pipeline_mode = #tpu.pipeline_mode<synchronous>, transform_indices = @transform_2, window_bounds = array<i64: 128, 128>}, {pipeline_mode = #tpu.pipeline_mode<synchronous>, transform_indices = @transform_3, window_bounds = array<i64: 8, 128>}, {pipeline_mode = #tpu.pipeline_mode<synchronous>, transform_indices = @transform_4, window_bounds = array<i64: 128, 128>}, {pipeline_mode = #tpu.pipeline_mode<synchronous>, transform_indices = @transform_5, window_bounds = array<i64: 8, 128>}, {transform_indices = @transform_6, window_bounds = array<i64: 32, 128>}]} {
    %c0_i32 = arith.constant 0 : i32
    %0 = arith.cmpi eq, %arg1, %c0_i32 : i32
    %1 = arith.extui %0 : i1 to i32
    %c0_i32_0 = arith.constant 0 : i32
    %2 = arith.cmpi ne, %1, %c0_i32_0 : i32
    scf.if %2 {
      %cst_19 = arith.constant 0.000000e+00 : f32
      %25 = vector.broadcast %cst_19 : f32 to vector<32x128xf32>
      %c0_20 = arith.constant 0 : index
      %c0_21 = arith.constant 0 : index
      %26 = vector.load %arg9[%c0_20, %c0_21] : memref<32x128xf32, #tpu.memory_space<vmem>>, vector<32x128xf32>
      tpu.vector_store %arg9[%c0_20, %c0_21], %25 {strides = array<i32>} : memref<32x128xf32, #tpu.memory_space<vmem>>, vector<32x128xf32>,
    } else {
    }
    %c0 = arith.constant 0 : index
    %c0_1 = arith.constant 0 : index
    %3 = vector.load %arg3[%c0, %c0_1] : memref<32x128xi8, #tpu.memory_space<vmem>>, vector<32x128xi8>
    %c0_i8 = arith.constant 0 : i8
    %4 = vector.broadcast %c0_i8 : i8 to vector<32x128xi8>
    %5 = arith.cmpi ne, %3, %4 : vector<32x128xi8>
    %c0_2 = arith.constant 0 : index
    %c0_3 = arith.constant 0 : index
    %6 = vector.load %arg2[%c0_2, %c0_3] : memref<32x128xbf16, #tpu.memory_space<vmem>>, vector<32x128xbf16>
    %cst = arith.constant 0.000000e+00 : bf16
    %7 = vector.broadcast %cst : bf16 to vector<32x128xbf16>
    %8 = arith.select %5, %6, %7 : vector<32x128xi1>, vector<32x128xbf16>
    %c0_4 = arith.constant 0 : index
    %c0_5 = arith.constant 0 : index
    %9 = vector.load %arg4[%c0_4, %c0_5] : memref<128x128xbf16, #tpu.memory_space<vmem>>, vector<128x128xbf16>
    %cst_6 = arith.constant dense<0.000000e+00> : vector<32x128xf32>
    %10 = tpu.matmul %8, %9, %cst_6 {dimension_numbers = #tpu.dot_dimension_numbers<[1], [0], [0], [1], [0, 0, 1, 1], [], []>} : vector<32x128xbf16>, vector<128x128xbf16>, vector<32x128xf32> -> vector<32x128xf32>
    %c0_7 = arith.constant 0 : index
    %c0_8 = arith.constant 0 : index
    %11 = vector.load %arg5[%c0_7, %c0_8] : memref<8x128xf32, #tpu.memory_space<vmem>>, vector<1x128xf32>
    %12 = vector.broadcast %11 : vector<1x128xf32> to vector<32x128xf32>
    %13 = arith.addf %10, %12 : vector<32x128xf32>
    %cst_9 = arith.constant 0.000000e+00 : f32
    %14 = vector.broadcast %cst_9 : f32 to vector<32x128xf32>
    %15 = arith.maximumf %13, %14 : vector<32x128xf32>
    %16 = arith.truncf %15 : vector<32x128xf32> to vector<32x128xbf16>
    %c0_10 = arith.constant 0 : index
    %c0_11 = arith.constant 0 : index
    %17 = vector.load %arg9[%c0_10, %c0_11] : memref<32x128xf32, #tpu.memory_space<vmem>>, vector<32x128xf32>
    %c0_12 = arith.constant 0 : index
    %c0_13 = arith.constant 0 : index
    %18 = vector.load %arg6[%c0_12, %c0_13] : memref<128x128xbf16, #tpu.memory_space<vmem>>, vector<128x128xbf16>
    %cst_14 = arith.constant dense<0.000000e+00> : vector<32x128xf32>
    %19 = tpu.matmul %16, %18, %cst_14 {dimension_numbers = #tpu.dot_dimension_numbers<[1], [0], [0], [1], [0, 0, 1, 1], [], []>} : vector<32x128xbf16>, vector<128x128xbf16>, vector<32x128xf32> -> vector<32x128xf32>
    %20 = arith.addf %17, %19 : vector<32x128xf32>
    %c0_15 = arith.constant 0 : index
    %c0_16 = arith.constant 0 : index
    %21 = vector.load %arg9[%c0_15, %c0_16] : memref<32x128xf32, #tpu.memory_space<vmem>>, vector<32x128xf32>
    tpu.vector_store %arg9[%c0_15, %c0_16], %20 {strides = array<i32>} : memref<32x128xf32, #tpu.memory_space<vmem>>, vector<32x128xf32>,
    %c0_i32_17 = arith.constant 0 : i32
    %22 = arith.cmpi eq, %arg1, %c0_i32_17 : i32
    %23 = arith.extui %22 : i1 to i32
    %c0_i32_18 = arith.constant 0 : i32
    %24 = arith.cmpi ne, %23, %c0_i32_18 : i32
    scf.if %24 {
      %c0_19 = arith.constant 0 : index
      %c0_20 = arith.constant 0 : index
      %25 = vector.load %arg9[%c0_19, %c0_20] : memref<32x128xf32, #tpu.memory_space<vmem>>, vector<32x128xf32>
      %c0_21 = arith.constant 0 : index
      %c0_22 = arith.constant 0 : index
      %26 = vector.load %arg7[%c0_21, %c0_22] : memref<8x128xf32, #tpu.memory_space<vmem>>, vector<1x128xf32>
      %27 = vector.broadcast %26 : vector<1x128xf32> to vector<32x128xf32>
      %28 = arith.addf %25, %27 : vector<32x128xf32>
      %c0_23 = arith.constant 0 : index
      %c0_24 = arith.constant 0 : index
      %29 = vector.load %arg8[%c0_23, %c0_24] : memref<32x128xf32, #tpu.memory_space<vmem>>, vector<32x128xf32>
      tpu.vector_store %arg8[%c0_23, %c0_24], %28 {strides = array<i32>} : memref<32x128xf32, #tpu.memory_space<vmem>>, vector<32x128xf32>,
    } else {
    }
    return
  }
  func.func @transform_0(%arg0: i32, %arg1: i32) -> (i32, i32) {
    %c0_i32 = arith.constant 0 : i32
    %c0_i32_0 = arith.constant 0 : i32
    return %arg0, %c0_i32 : i32, i32
  }
  func.func @transform_1(%arg0: i32, %arg1: i32) -> (i32, i32) {
    %c0_i32 = arith.constant 0 : i32
    %c0_i32_0 = arith.constant 0 : i32
    return %arg0, %c0_i32 : i32, i32
  }
  func.func @transform_2(%arg0: i32, %arg1: i32) -> (i32, i32) {
    %c0_i32 = arith.constant 0 : i32
    %c0_i32_0 = arith.constant 0 : i32
    return %c0_i32, %arg1 : i32, i32
  }
  func.func @transform_3(%arg0: i32, %arg1: i32) -> (i32, i32) {
    %c0_i32 = arith.constant 0 : i32
    %c0_i32_0 = arith.constant 0 : i32
    return %c0_i32, %arg1 : i32, i32
  }
  func.func @transform_4(%arg0: i32, %arg1: i32) -> (i32, i32) {
    %c0_i32 = arith.constant 0 : i32
    %c0_i32_0 = arith.constant 0 : i32
    return %arg1, %c0_i32 : i32, i32
  }
  func.func @transform_5(%arg0: i32, %arg1: i32) -> (i32, i32) {
    %c0_i32 = arith.constant 0 : i32
    %c0_i32_0 = arith.constant 0 : i32
    %c0_i32_1 = arith.constant 0 : i32
    return %c0_i32, %c0_i32_0 : i32, i32
  }
  func.func @transform_6(%arg0: i32, %arg1: i32) -> (i32, i32) {
    %c0_i32 = arith.constant 0 : i32
    %c0_i32_0 = arith.constant 0 : i32
    return %arg0, %c0_i32 : i32, i32
  }
}

</mosaic_0001>

<bundles_post_ra>
// kernel: tpu_custom_call.1
= control target key start
LH: loop header
LB: loop body
LE: loop exit
PB: predicated region body
PF: predicated region fallthrough
CT: control target
= control target key end

     0   :  { %11 = vsyncpa [#allocation4], 0  ;;  %s808_s0 = inlined_call_operand.hbm [shape: bf16[32,128], index: 0, kind: input, shape index: {}]   ;;  %s809_s1 = inlined_call_operand.hbm [shape: s8[32,128], index: 1, kind: input, shape index: {}]   ;;  %s810_s2 = inlined_call_operand.hbm [shape: bf16[128,128], index: 2, kind: input, shape index: {}]   ;;  %s811_s3 = inlined_call_operand.hbm [shape: f32[8,128], index: 3, kind: input, shape index: {}]   ;;  %s812_s4 = inlined_call_operand.hbm [shape: bf16[128,128], index: 4, kind: input, shape index: {}]   ;;  %s813_s5 = inlined_call_operand.hbm [shape: f32[8,128], index: 5, kind: input, shape index: {}]   ;;  %s814_s6 = inlined_call_operand.hbm [shape: f32[32,128], index: 6, kind: output, shape index: {}]  }
   0x1   :  { %12 = vsyncpa [#allocation7], 0 }
   0x2   :  { %13 = vsyncpa [#allocation10], 0 }
   0x3   :  { %14 = vsyncpa [#allocation13], 0  ;;  %s34_s23 = sshll.u32 %s809_s1, 4  ;;  %s35_s23 = int_to_ptr.hbm [resolvable:$true] %s34_s23 }
   0x4   :  { %15 = vsyncpa [#allocation5], 0  ;;  %s728_s24 = smov [#allocation6]   ;;  %s58_s28 = sshll.u32 %s811_s3, 4  ;;  %s59_s28 = int_to_ptr.hbm [resolvable:$true] %s58_s28 }
   0x5   :  { %s36_s25 = sshll.u32 %s728_s24, 4  ;;  %s729_s29 = smov [#allocation9]   ;;  %s37_s25 = int_to_ptr.vmem [resolvable:$true] %s36_s25 }
   0x6   :  { %39 = dma.hbm_to_vmem [thread:$0]  %s35_s23, 128, %s37_s25, [#allocation7]  }
   0x7   :  { %s60_s30 = sshll.u32 %s729_s29, 4  ;;  %s20_s9 = sshll.u32 %s808_s0, 4  ;;  %s61_s30 = int_to_ptr.vmem [resolvable:$true] %s60_s30  ;;  %s21_s9 = int_to_ptr.hbm [resolvable:$true] %s20_s9 }
   0x8   :  { %63 = dma.hbm_to_vmem [thread:$0]  %s59_s28, 128, %s61_s30, [#allocation10]  }
   0x9   :  { %s730_s1 = smov [#allocation3]   ;;  %s44_s13 = sshll.u32 %s810_s2, 4  ;;  %s45_s13 = int_to_ptr.hbm [resolvable:$true] %s44_s13 }
   0xa   :  { %s22_s10 = sshll.u32 %s730_s1, 4  ;;  %s731_s14 = smov 64   ;;  %s23_s10 = int_to_ptr.vmem [resolvable:$true] %s22_s10 }
   0xb   :  { %s732_s3 = smov 4   ;;  %s733_s15 = smov [#allocation8]  }
   0xc   :  { %28 = dma.hbm_to_vmem [thread:$0]  %s21_s9, 256, %s23_s10, [#allocation4], %s731_s14, %s731_s14, %s732_s3  }
   0xd   :  { %s46_s16 = sshll.u32 %s733_s15, 4  ;;  %s68_s0 = sshll.u32 %s812_s4, 4  ;;  %s47_s16 = int_to_ptr.vmem [resolvable:$true] %s46_s16  ;;  %s69_s0 = int_to_ptr.hbm [resolvable:$true] %s68_s0 }
   0xe   :  { %52 = dma.hbm_to_vmem [thread:$0]  %s45_s13, 1024, %s47_s16, [#allocation7], %s731_s14, %s731_s14, %s732_s3  }
   0xf   :  { %s82_s21 = sshll.u32 %s813_s5, 4  ;;  %s734_s22 = smov [#allocation11]   ;;  %s83_s21 = int_to_ptr.hbm [resolvable:$true] %s82_s21 }
  0x10   :  { %s70_s23 = sshll.u32 %s734_s22, 4  ;;  %s735_s2 = smov [#allocation12]   ;;  %s71_s23 = int_to_ptr.vmem [resolvable:$true] %s70_s23 }
  0x11   :  { %76 = dma.hbm_to_vmem [thread:$0]  %s69_s0, 1024, %s71_s23, [#allocation10], %s731_s14, %s731_s14, %s732_s3  }
  0x12   :  { %s84_s24 = sshll.u32 %s735_s2, 4  ;;  %s85_s24 = int_to_ptr.vmem [resolvable:$true] %s84_s24 }
  0x13   :  { %87 = dma.hbm_to_vmem [thread:$0]  %s83_s21, 128, %s85_s24, [#allocation13]  }
  0x14   :  { %718 = dma.done.wait [#allocation4], 256  }
  0x15   :  { %719 = vsyncadd [#allocation4], 4294967040 }
  0x16   :  { %720 = dma.done.wait [#allocation7], 1152  }
  0x17   :  { %721 = vsyncadd [#allocation7], 4294966144 }
  0x18   :  { %722 = dma.done.wait [#allocation10], 1152  }
  0x19   :  { %723 = vsyncadd [#allocation10], 4294966144 }
  0x1a   :  { %724 = dma.done.wait [#allocation13], 128  }
  0x1b   :  { %725 = vsyncadd [#allocation13], 4294967168  ;;  %v511_v0 = vld [vmem:[#allocation8 + $0x38] sm:$0xff]  ;;  %v510_v1 = vld [vmem:[#allocation8 + $0x30] sm:$0xff]  ;;  %v736_v3 = vmov 0   ;;  %s737_s4 = smov [#allocation14]  }
  0x1c   :  { %273 = vmatpush.bf16.msra.mxu0 %v511_v0  ;;  %520 = vmatpush.bf16.msra.mxu2 %v511_v0  ;;  %v124_v2 = vld [vmem:[#allocation6] sm:$0xff]  ;;  %v519_v5 = vld [vmem:[#allocation11 + $0x38] sm:$0xff]  ;;  %v509_v10 = vld [vmem:[#allocation8 + $0x28] sm:$0xff]  ;;  %v165_v21 = vunpack.c.l.b16 %v736_v3  ;;  %v166_v25 = vunpack.c.h.b16 %v736_v3  ;;  %s414_s5 = sshll.u32 %s737_s4, 4  ;;  %s416_s27 = sshll.u32 %s814_s6, 4  ;;  %s415_s5 = int_to_ptr.vmem [resolvable:$true] %s414_s5  ;;  %s417_s27 = int_to_ptr.hbm [resolvable:$true] %s416_s27 }
  0x1d   :  { %vm125_vm0 = vnez %v124_v2  ;;  %366 = vmatpush.bf16.msra.mxu1 %v519_v5  ;;  %v518_v15 = vld [vmem:[#allocation11 + $0x30] sm:$0xff]  ;;  %528 = vmatpush.bf16.msra.mxu3 %v519_v5  ;;  %v508_v20 = vld [vmem:[#allocation8 + $0x20] sm:$0xff]  ;;  %v517_v22 = vld [vmem:[#allocation11 + $0x28] sm:$0xff]  ;;  %s738_s28 = smov 128   ;;  %s739_s29 = smov 8  }
  0x1e   :  { %v130_v4 = vsel %vm125_vm0, 16843009, %v736_v3  ;;  %v507_v31 = vld [vmem:[#allocation8 + $0x18] sm:$0xff]  ;;  %v516_v39 = vld [vmem:[#allocation11 + $0x20] sm:$0xff]  ;;  %v506_v44 = vld [vmem:[#allocation8 + $0x10] sm:$0xff] }
  0x1f   :  { %v131_v6 = vunpack.c.0.s8 %v130_v4  ;;  %v132_v7 = vunpack.c.1.s8 %v130_v4  ;;  %v133_v8 = vunpack.c.2.s8 %v130_v4  ;;  %v134_v9 = vunpack.c.3.s8 %v130_v4  ;;  %v126_v45 = vld [vmem:[#allocation3] sm:$0xf]  ;;  %v127_v46 = vld [vmem:[#allocation3 + $0x4] sm:$0xf]  ;;  %v128_v51 = vld [vmem:[#allocation3 + $0x8] sm:$0xf] }
  0x20   :  { %274 = vmatpush.bf16.msra.mxu0 %v510_v1  ;;  %521 = vmatpush.bf16.msra.mxu2 %v510_v1  ;;  %v129_v52 = vld [vmem:[#allocation3 + $0xc] sm:$0xf]  ;;  %v505_v53 = vld [vmem:[#allocation8 + $0x8] sm:$0xff]  ;;  %v504_v62 = vld [vmem:[#allocation8] sm:$0xff] }
  0x21   :  { %v135_v11 = vpack.c.b16 %v131_v6, %v131_v6  ;;  %v137_v12 = vpack.c.b16 %v132_v7, %v132_v7  ;;  %v139_v13 = vpack.c.b16 %v133_v8, %v133_v8  ;;  %v141_v14 = vpack.c.b16 %v134_v9, %v134_v9  ;;  %367 = vmatpush.bf16.msra.mxu1 %v518_v15  ;;  %v515_v1 = vld [vmem:[#allocation11 + $0x18] sm:$0xff]  ;;  %v514_v2 = vld [vmem:[#allocation11 + $0x10] sm:$0xff]  ;;  %v512_v4 = vld [vmem:[#allocation11] sm:$0xff] }
  0x22   :  { %529 = vmatpush.bf16.msra.mxu3 %v518_v15  ;;  %v548_v6 = vld [vmem:[#allocation9] ss:$0 sm:$0xff] }
  0x23   :  { %v136_v16 = vpack.c.b8 %v135_v11, %v135_v11  ;;  %v138_v17 = vpack.c.b8 %v137_v12, %v137_v12  ;;  %v140_v18 = vpack.c.b8 %v139_v13, %v139_v13  ;;  %v142_v19 = vpack.c.b8 %v141_v14, %v141_v14 }
  0x24   :  { %275 = vmatpush.bf16.msra.mxu0 %v509_v10  ;;  %522 = vmatpush.bf16.msra.mxu2 %v509_v10 }
  0x25   :  { %vm143_vm1 = vnez %v136_v16  ;;  %vm144_vm2 = vnez %v138_v17  ;;  %vm145_vm3 = vnez %v140_v18  ;;  %vm146_vm4 = vnez %v142_v19  ;;  %368 = vmatpush.bf16.msra.mxu1 %v517_v22 }
  0x26   :  { %v147_v23 = vsel %vm143_vm1, 16843009, %v736_v3  ;;  %v148_v24 = vsel %vm144_vm2, 16843009, %v736_v3  ;;  %v149_v26 = vsel %vm145_vm3, 16843009, %v736_v3  ;;  %530 = vmatpush.bf16.msra.mxu3 %v517_v22 }
  0x27   :  { %v151_v27 = vunpack.c.1.s8 %v147_v23  ;;  %v152_v28 = vunpack.c.0.s8 %v147_v23  ;;  %v154_v29 = vunpack.c.1.s8 %v148_v24  ;;  %v155_v30 = vunpack.c.0.s8 %v148_v24 }
  0x28   :  { %276 = vmatpush.bf16.msra.mxu0 %v508_v20  ;;  %523 = vmatpush.bf16.msra.mxu2 %v508_v20  ;;  %v150_v32 = vsel %vm146_vm4, 16843009, %v736_v3  ;;  %v157_v33 = vunpack.c.1.s8 %v149_v26  ;;  %v158_v34 = vunpack.c.0.s8 %v149_v26  ;;  %v513_v3 = vld [vmem:[#allocation11 + $0x8] sm:$0xff]  ;;  %v549_v20 = vld [vmem:[#allocation12] ss:$0 sm:$0xff] }
  0x29   :  { %v432_v35 = vunpack.i.l.s16 %v152_v28  ;;  %v433_v36 = vunpack.i.l.s16 %v151_v27  ;;  %v434_v37 = vunpack.i.l.s16 %v155_v30  ;;  %v435_v38 = vunpack.i.l.s16 %v154_v29  ;;  %369 = vmatpush.bf16.msra.mxu1 %v516_v39 }
  0x2a   :  { %v160_v40 = vunpack.c.1.s8 %v150_v32  ;;  %v161_v41 = vunpack.c.0.s8 %v150_v32  ;;  %v436_v42 = vunpack.i.l.s16 %v158_v34  ;;  %v437_v43 = vunpack.i.l.s16 %v157_v33  ;;  %531 = vmatpush.bf16.msra.mxu3 %v516_v39 }
  0x2b   :  { %vm167_vm5 = vcmp.ne.s32.totalorder %v432_v35, %v165_v21  ;;  %vm168_vm6 = vcmp.ne.s32.totalorder %v433_v36, %v166_v25  ;;  %vm174_vm7 = vcmp.ne.s32.totalorder %v434_v37, %v165_v21  ;;  %vm175_vm8 = vcmp.ne.s32.totalorder %v435_v38, %v166_v25 }
  0x2c   :  { %277 = vmatpush.bf16.msra.mxu0 %v507_v31  ;;  %524 = vmatpush.bf16.msra.mxu2 %v507_v31  ;;  %vm793_vm9 = vmpackc.low %vm168_vm6, %vm167_vm5  ;;  %vm181_vm10 = vcmp.ne.s32.totalorder %v436_v42, %v165_v21  ;;  %vm182_vm11 = vcmp.ne.s32.totalorder %v437_v43, %v166_v25  ;;  %v438_v48 = vunpack.i.l.s16 %v161_v41  ;;  %v439_v49 = vunpack.i.l.s16 %v160_v40 }
  0x2d   :  { %vm797_vm12 = vmpackc.low %vm175_vm8, %vm174_vm7  ;;  %v191_v54 = vsel %vm793_vm9, %v126_v45, 0  ;;  %370 = vmatpush.bf16.msra.mxu1 %v515_v1 }
  0x2e   :  { %vm183_vm13 = vmpackc.low %vm182_vm11, %vm181_vm10  ;;  %vm188_vm14 = vcmp.ne.s32.totalorder %v438_v48, %v165_v21  ;;  %vm189_vm15 = vcmp.ne.s32.totalorder %v439_v49, %v166_v25  ;;  %v192_v55 = vsel %vm797_vm12, %v127_v46, 0  ;;  %v217_v58 = vunpack.c.l.b16 %v191_v54  ;;  %532 = vmatpush.bf16.msra.mxu3 %v515_v1 }
  0x2f   :  { %vm190_vm0 = vmpackc.low %vm189_vm15, %vm188_vm14  ;;  %v193_v56 = vsel %vm183_vm13, %v128_v51, 0  ;;  %v218_v59 = vunpack.c.l.b16 %v192_v55 }
  0x30   :  { %278 = vmatpush.bf16.msra.mxu0 %v506_v44  ;;  %525 = vmatpush.bf16.msra.mxu2 %v506_v44  ;;  %v194_v57 = vsel %vm190_vm0, %v129_v52, 0  ;;  %v219_v60 = vunpack.c.l.b16 %v193_v56 }
  0x31   :  { %v220_v61 = vunpack.c.l.b16 %v194_v57  ;;  %v221_v63 = vpack.c.b16 %v218_v59, %v217_v58  ;;  %371 = vmatpush.bf16.msra.mxu1 %v514_v2 }
  0x32   :  { %533 = vmatpush.bf16.msra.mxu3 %v514_v2 }
  0x33   :  { %v222_v0 = vpack.c.b16 %v220_v61, %v219_v60 }
  0x34   :  { %279 = vmatpush.bf16.msra.mxu0 %v505_v53  ;;  %526 = vmatpush.bf16.msra.mxu2 %v505_v53 }
  0x35   :  { %372 = vmatpush.bf16.msra.mxu1 %v513_v3 }
  0x36   :  { %534 = vmatpush.bf16.msra.mxu3 %v513_v3 }
  0x38   :  { %280 = vmatpush.bf16.msra.mxu0 %v504_v62  ;;  %527 = vmatpush.bf16.msra.mxu2 %v504_v62 }
  0x39   :  { %373 = vmatpush.bf16.msra.mxu1 %v512_v4 }
  0x3a   :  { %535 = vmatpush.bf16.msra.mxu3 %v512_v4 }
  0x3b   :  { %281 = vmatmul.bf16.vlgmr.msra.gmra.mxu0 %v221_v63  ;;  %286 = vmatmul.bf16.vlgmr.msra.gmra.mxu2 %v222_v0 }
  0xb8   :  { %v282_v5 = vpop.f32.mrf.mxu0 }
  0xb9   :  { %v283_v7 = vadd.f32 %v548_v6, %v282_v5 }
  0xbb   :  { %v292_v10 = vmax.f32 %v283_v7, 0.0 }
  0xbe   :  { %v287_v8 = vpop.f32.mrf.mxu2 }
  0xbf   :  { %v288_v13 = vadd.f32 %v548_v6, %v287_v8 }
  0xc0   :  { %v284_v9 = vpop.f32.mrf.mxu0 }
  0xc1   :  { %v285_v11 = vadd.f32 %v548_v6, %v284_v9  ;;  %v294_v17 = vmax.f32 %v288_v13, 0.0 }
  0xc3   :  { %v293_v12 = vmax.f32 %v285_v11, 0.0 }
  0xc5   :  { %v296_v14 = vpack.c.bf16 %v293_v12, %v292_v10 }
  0xc6   :  { %v289_v15 = vpop.f32.mrf.mxu2 }
  0xc7   :  { %v290_v16 = vadd.f32 %v548_v6, %v289_v15  ;;  %374 = vmatmul.bf16.vlgmr.msra.gmra.mxu1 %v296_v14 }
  0xc9   :  { %v295_v18 = vmax.f32 %v290_v16, 0.0 }
  0xcb   :  { %v297_v19 = vpack.c.bf16 %v295_v18, %v294_v17 }
  0xcd   :  { %379 = vmatmul.bf16.vlgmr.msra.gmra.mxu3 %v297_v19 }
 0x144   :  { %v375_v21 = vpop.f32.mrf.mxu1 }
 0x145   :  { %v402_v22 = vadd.f32 %v549_v20, %v375_v21 }
 0x147   :  { %406 = vst [vmem:[#allocation14] sm:$0xff] %v402_v22 }
 0x14c   :  { %v377_v23 = vpop.f32.mrf.mxu1 }
 0x14d   :  { %v403_v24 = vadd.f32 %v549_v20, %v377_v23 }
 0x14f   :  { %407 = vst [vmem:[#allocation14 + $0x8] sm:$0xff] %v403_v24 }
 0x150   :  { %v380_v25 = vpop.f32.mrf.mxu3 }
 0x151   :  { %v404_v26 = vadd.f32 %v549_v20, %v380_v25 }
 0x153   :  { %408 = vst [vmem:[#allocation14 + $0x10] sm:$0xff] %v404_v26 }
 0x158   :  { %v382_v27 = vpop.f32.mrf.mxu3 }
 0x159   :  { %v405_v28 = vadd.f32 %v549_v20, %v382_v27 }
 0x15b   :  { %409 = vst [vmem:[#allocation14 + $0x18] sm:$0xff] %v405_v28 }
 0x15c   :  { %422 = dma.vmem_to_hbm [thread:$0]  %s415_s5, 512, %s417_s27, [#allocation5], %s738_s28, %s738_s28, %s739_s29  }
 0x15d   :  { %726 = dma.done.wait [#allocation5], 512  }
 0x15e   :  { %727 = vsyncadd [#allocation5], 4294966784 }
 0x15f   :  { %427 = vsyncpa [#allocation4], 1 }
 0x160   :  { %428 = vsyncpa [#allocation7], 1 }
 0x161   :  { %429 = vsyncpa [#allocation10], 1 }
 0x162   :  { %430 = vsyncpa [#allocation13], 1 }
 0x163   :  { %431 = vsyncpa [#allocation5], 1 }

</bundles_post_ra>
